<compile_context>
chip_gen: v6e
topology: v6e:2x2x1
jax: 0.10.0
libtpu: 0.0.40
codegen_flags: <defaults>
</compile_context>

<pallas_src>
import jax
import jax.numpy as jnp
from jax.experimental import pallas as pl
from jax.experimental.pallas import tpu as pltpu


# ---------------------------------------------------------------------------
# PE table construction — matches the PyTorch __init__ exactly, including its
# quirky exponent 10000 ** (2 * i / input_size) with i = 0, 2, 4, ...
# ---------------------------------------------------------------------------
def build_positional_encoding(input_size: int, max_seq_length: int = 512) -> jnp.ndarray:
    if input_size % 2 != 0:
        raise ValueError("input_size must be even (the reference writes pe[:, i + 1]).")
    pos = jnp.arange(max_seq_length, dtype=jnp.float32)[:, None]            # (L, 1)
    i = jnp.arange(0, input_size, 2, dtype=jnp.float32)[None, :]            # (1, D/2)
    denominator = jnp.power(jnp.float32(10000.0), 2.0 * i / input_size)     # (1, D/2)
    angle = pos / denominator                                               # (L, D/2)
    pe = jnp.zeros((max_seq_length, input_size), dtype=jnp.float32)
    pe = pe.at[:, 0::2].set(jnp.sin(angle))
    pe = pe.at[:, 1::2].set(jnp.cos(angle))
    return pe[None]                                                         # (1, L, D)


# ---------------------------------------------------------------------------
# Tiling / VMEM planning
# ---------------------------------------------------------------------------
_LANES = 128
# Below this total size, a fused XLA add beats any standalone kernel.
_XLA_FALLBACK_BYTES = 256 * 1024


def _sublane_multiple(itemsize: int) -> int:
    # Sub-32-bit dtypes pack along sublanes: 8 rows (f32), 16 (bf16), 32 (int8/fp8).
    return max(8, 32 // itemsize)


def _vmem_plan():
    """Return (per-tile byte target, scoped VMEM limit), derived from physical
    VMEM so 128 MiB parts (v5e/v6e) get bigger tiles than v7x (64 MiB/TC)."""
    try:
        cap = int(pltpu.get_tpu_info().vmem_capacity_bytes)
    except Exception:
        cap = 64 << 20          # conservative fallback: v7x per-TC VMEM
    limit = max(32 << 20, min((cap * 3) // 4, 96 << 20))
    # 3 logical buffers (x, pe, out), each double-buffered -> 6 resident tiles;
    # keep tile data at ~3/4 of the scoped limit for compiler scratch headroom.
    tile_bytes = (limit * 3 // 4) // 6
    return tile_bytes, limit


def _pick_row_tile(rows: int, lanes: int, itemsize: int,
                   min_row_blocks: int, tile_bytes: int) -> int:
    sub = _sublane_multiple(itemsize)
    if rows <= sub:
        return rows                                    # full extent: always a legal block
    tr = max(sub, ((tile_bytes // (lanes * itemsize)) // sub) * sub)
    if min_row_blocks > 1:
        cap = -(-rows // min_row_blocks)               # cdiv
        cap = max(sub, -(-cap // sub) * sub)           # round up to sublane multiple
        tr = min(tr, cap)
    return rows if rows <= tr else tr                  # ragged boundary handled by cdiv grid


def _fold(S: int, D: int):
    if (S * D) % _LANES == 0:
        return (S * D) // _LANES, _LANES
    # Fallback: D stays the (full-extent) lane dim; correct but lane-sparse
    # (masked stores) when D < 128.
    return S, D


def _prepare_pe(pe: jnp.ndarray, S: int, dtype) -> jnp.ndarray:
    """Slice + cast + lane-dense fold of the PE table. Cache this per (S, dtype)."""
    D = pe.shape[-1]
    rows, lanes = _fold(S, D)
    return pe[0, :S, :].astype(dtype).reshape(rows, lanes)


# ---------------------------------------------------------------------------
# Kernel
# ---------------------------------------------------------------------------
def _pe_add_kernel(x_ref, pe_ref, o_ref):
    # All refs are 2-D (tr, lanes) thanks to pl.Squeezed() on the batch dim.
    # Elementwise VPU add; HBM bandwidth is the real bottleneck.
    o_ref[...] = x_ref[...] + pe_ref[...]


def _pe_add_pallas(x2: jnp.ndarray, pe2: jnp.ndarray) -> jnp.ndarray:
    B, rows, lanes = x2.shape
    itemsize = jnp.dtype(x2.dtype).itemsize
    tile_bytes, vmem_limit = _vmem_plan()
    # When the batch axis can't feed both v7x TensorCores, split the row axis.
    min_row_blocks = 2 if B == 1 else 1
    tr = _pick_row_tile(rows, lanes, itemsize, min_row_blocks, tile_bytes)
    grid = (pl.cdiv(rows, tr), B)

    cost = pl.CostEstimate(
        flops=B * rows * lanes,
        transcendentals=0,
        bytes_accessed=(2 * B + 1) * rows * lanes * itemsize,  # read x + write out + read pe once
    )

    return pl.pallas_call(
        _pe_add_kernel,
        out_shape=jax.ShapeDtypeStruct((B, rows, lanes), x2.dtype),
        grid_spec=pltpu.PrefetchScalarGridSpec(
            num_scalar_prefetch=0,
            # Batch innermost + batch-invariant PE index_map => each PE tile is
            # DMA'd from HBM once (Pallas skips re-DMA when the block index is
            # unchanged between consecutive grid steps).
            grid=grid,
            in_specs=[
                pl.BlockSpec((pl.Squeezed(), tr, lanes), lambda r, b: (b, r, 0)),
                pl.BlockSpec((tr, lanes), lambda r, b: (r, 0)),
            ],
            out_specs=pl.BlockSpec((pl.Squeezed(), tr, lanes), lambda r, b: (b, r, 0)),
        ),
        compiler_params=pltpu.CompilerParams(
            dimension_semantics=("parallel", "parallel"),
            vmem_limit_bytes=vmem_limit,
        ),
        cost_estimate=cost,
    )(x2, pe2)


# ---------------------------------------------------------------------------
# Public wrappers
# ---------------------------------------------------------------------------
def positional_encoder_forward(x: jnp.ndarray, pe: jnp.ndarray, *,
                               xla_fallback_bytes: int = _XLA_FALLBACK_BYTES,
                               pe_folded: jnp.ndarray | None = None) -> jnp.ndarray:
    """x: (B, S, D); pe: (1, max_seq_length, D) from build_positional_encoding."""
    B, S, D = x.shape
    if pe.shape[-1] != D:
        raise ValueError(f"PE feature dim {pe.shape[-1]} != input feature dim {D}")
    if S > pe.shape[1]:
        raise ValueError(f"sequence length {S} exceeds max_seq_length {pe.shape[1]}")

    itemsize = jnp.dtype(x.dtype).itemsize
    if B * S * D * itemsize <= xla_fallback_bytes:
        # Tiny tensors: fixed pallas_call / grid-step overhead dominates; let XLA fuse it.
        return x + pe[:, :S, :].astype(x.dtype)

    rows, lanes = _fold(S, D)
    pe2 = pe_folded if pe_folded is not None else _prepare_pe(pe, S, x.dtype)
    x2 = x.reshape(B, rows, lanes)
    out = _pe_add_pallas(x2, pe2)
    return out.reshape(B, S, D)


class PositionalEncoder:
    """Mirrors the PyTorch module; caches the pre-sliced/cast/folded PE per
    (seq_len, dtype) so the mem-bound kernel never pays an extra PE round-trip."""

    def __init__(self, input_size: int, max_seq_length: int = 512):
        self.input_size = input_size
        self.max_seq_length = max_seq_length
        self.pe = build_positional_encoding(input_size, max_seq_length)
        self._pe_cache = {}

    def __call__(self, x: jnp.ndarray, *,
                 xla_fallback_bytes: int = _XLA_FALLBACK_BYTES) -> jnp.ndarray:
        B, S, D = x.shape
        key = (S, jnp.dtype(x.dtype).name)
        if key not in self._pe_cache:
            self._pe_cache[key] = jax.block_until_ready(_prepare_pe(self.pe, S, x.dtype))
        return positional_encoder_forward(x, self.pe,
                                          xla_fallback_bytes=xla_fallback_bytes,
                                          pe_folded=self._pe_cache[key])


# ---------------------------------------------------------------------------
# Demo / correctness checks
# ---------------------------------------------------------------------------
if __name__ == "__main__":
    # 1) Module-consistent small shape (batch=2, seq=8, input_size=32),
    #    forced through the Pallas path (fallback disabled).
    B, S, D = 2, 8, 32
    pe = build_positional_encoding(D, max_seq_length=64)
    x = jax.random.normal(jax.random.PRNGKey(0), (B, S, D), dtype=jnp.float32)
    ref = x + pe[:, :S, :]
    out = jax.block_until_ready(positional_encoder_forward(x, pe, xla_fallback_bytes=0))
    assert out.shape == (B, S, D)
    assert jnp.allclose(out, ref, atol=1e-6, rtol=1e-6)

    # 2) Same shape via the default (XLA fast-path) route.
    out_xla = jax.block_until_ready(positional_encoder_forward(x, pe))
    assert jnp.allclose(out_xla, ref, atol=1e-6, rtol=1e-6)

    # 3) Lane-dense path with per-(S, dtype) PE caching through the class.
    enc = PositionalEncoder(input_size=128, max_seq_length=128)
    xb = jax.random.normal(jax.random.PRNGKey(1), (2, 64, 128), dtype=jnp.float32)
    refb = xb + enc.pe[:, :64, :]
    outb = jax.block_until_ready(enc(xb, xla_fallback_bytes=0))
    assert jnp.allclose(outb, refb, atol=1e-6, rtol=1e-6)

    # 4) B == 1: row axis splits into >=2 grid blocks (keeps both v7x TCs busy).
    x1 = jax.random.normal(jax.random.PRNGKey(2), (1, 16, 128), dtype=jnp.float32)
    ref1 = x1 + enc.pe[:, :16, :]
    out1 = jax.block_until_ready(enc(x1, xla_fallback_bytes=0))
    assert jnp.allclose(out1, ref1, atol=1e-6, rtol=1e-6)

    # 5) bf16 input: dtype-aware sublane multiple (16); compare against the same
    #    same-dtype XLA add (PyTorch adds in f32; differences are sub-ULP-of-bf16).
    xh = jax.random.normal(jax.random.PRNGKey(3), (2, 16, 128), dtype=jnp.bfloat16)
    refh = xh + enc.pe[0, :16, :].astype(jnp.bfloat16)[None]
    outh = jax.block_until_ready(enc(xh, xla_fallback_bytes=0))
    assert jnp.allclose(outh.astype(jnp.float32), refh.astype(jnp.float32),
                        atol=1e-2, rtol=1e-2)

    print("KERNEL_OK")
</pallas_src>

<mosaic_0001>
module attributes {stable_mosaic.version = 11 : i64} {
  func.func @_pe_add_kernel(%arg0: i32, %arg1: i32, %arg2: memref<1x2x128xf32, #tpu.memory_space<vmem>>, %arg3: memref<2x128xf32, #tpu.memory_space<vmem>>, %arg4: memref<1x2x128xf32, #tpu.memory_space<vmem>>) attributes {dimension_semantics = [#tpu.dimension_semantics<parallel>, #tpu.dimension_semantics<parallel>], iteration_bounds = array<i64: 1, 2>, scalar_prefetch = 0 : i64, scratch_operands = 0 : i64, tpu.core_type = #tpu.core_type<tc>, window_params = [{transform_indices = @transform_0, window_bounds = array<i64: 1, 2, 128>}, {transform_indices = @transform_1, window_bounds = array<i64: 2, 128>}, {transform_indices = @transform_2, window_bounds = array<i64: 1, 2, 128>}]} {
    %c0 = arith.constant 0 : index
    %c0_0 = arith.constant 0 : index
    %c0_1 = arith.constant 0 : index
    %0 = vector.load %arg2[%c0, %c0_0, %c0_1] : memref<1x2x128xf32, #tpu.memory_space<vmem>>, vector<1x2x128xf32>
    %1 = vector.shape_cast %0 : vector<1x2x128xf32> to vector<2x128xf32>
    %c0_2 = arith.constant 0 : index
    %c0_3 = arith.constant 0 : index
    %2 = vector.load %arg3[%c0_2, %c0_3] : memref<2x128xf32, #tpu.memory_space<vmem>>, vector<2x128xf32>
    %3 = arith.addf %1, %2 : vector<2x128xf32>
    %c0_4 = arith.constant 0 : index
    %c0_5 = arith.constant 0 : index
    %c0_6 = arith.constant 0 : index
    %4 = vector.load %arg4[%c0_4, %c0_5, %c0_6] : memref<1x2x128xf32, #tpu.memory_space<vmem>>, vector<1x2x128xf32>
    %5 = vector.shape_cast %4 : vector<1x2x128xf32> to vector<2x128xf32>
    %6 = vector.shape_cast %3 : vector<2x128xf32> to vector<1x2x128xf32>
    tpu.vector_store %arg4[%c0_4, %c0_5, %c0_6], %6 {strides = array<i32>} : memref<1x2x128xf32, #tpu.memory_space<vmem>>, vector<1x2x128xf32>,
    return
  }
  func.func @transform_0(%arg0: i32, %arg1: i32) -> (i32, i32, i32) {
    %c0_i32 = arith.constant 0 : i32
    %c0_i32_0 = arith.constant 0 : i32
    return %arg1, %arg0, %c0_i32 : i32, i32, i32
  }
  func.func @transform_1(%arg0: i32, %arg1: i32) -> (i32, i32) {
    %c0_i32 = arith.constant 0 : i32
    %c0_i32_0 = arith.constant 0 : i32
    return %arg0, %c0_i32 : i32, i32
  }
  func.func @transform_2(%arg0: i32, %arg1: i32) -> (i32, i32, i32) {
    %c0_i32 = arith.constant 0 : i32
    %c0_i32_0 = arith.constant 0 : i32
    return %arg1, %arg0, %c0_i32 : i32, i32, i32
  }
}

</mosaic_0001>

<bundles_post_ra>
// kernel: tpu_custom_call.1
= control target key start
LH: loop header
LB: loop body
LE: loop exit
PB: predicated region body
PF: predicated region fallthrough
CT: control target
= control target key end

     0   :  { %7 = vsyncpa [#allocation3], 0  ;;  %s714_s0 = inlined_call_operand.hbm [shape: f32[2,2,128], index: 0, kind: input, shape index: {}]   ;;  %s715_s1 = inlined_call_operand.hbm [shape: f32[2,128], index: 1, kind: input, shape index: {}]   ;;  %s716_s2 = inlined_call_operand.hbm [shape: f32[2,2,128], index: 2, kind: output, shape index: {}]  }
   0x1   :  { %9 = vsyncpa [#allocation3 + $0x1], 0 }
   0x2   :  { %10 = vsyncpa [#allocation6], 0 }
   0x3   :  { %11 = vsyncpa [#allocation4], 0 }
   0x4   :  { %13 = vsyncpa [#allocation4 + $0x1], 0  ;;  %s553_s9 = smov 0   ;;  %s555_s10 = smov 0  }
   0x5   :  { %s557_s11 = smov 0   ;;  %s559_s12 = smov 0  }
   0x6   :  { %s561_s13 = smov 0   ;;  %s563_s14 = smov 0  }
   0x7 LB: > { %s307_s15 = sadd.s32 4294967295, %s533_s14   ;;  %s308_s16 = sadd.s32 4294967294, %s533_s14   ;;  %s533_s14 = sphi %s563_s14, %s19_s14   ;;  %s529_s13 = sphi %s561_s13, %s733_s13   ;;  %s525_s12 = sphi %s559_s12, %s732_s12   ;;  %s521_s11 = sphi %s557_s11, %s731_s11   ;;  %s517_s10 = sphi %s555_s10, %s730_s10   ;;  %s513_s9 = sphi %s553_s9, %s729_s9  }
   0x8   : > { %p53_p0 = scmp.ne.s32.totalorder %s517_s10, %s513_s9  ;;  %p587_p1 = scmp.eq.s32.totalorder %s307_s15, 0 }
   0x9   : > { %p591_p2 = scmp.eq.s32.totalorder %s307_s15, 1  ;;  %p111_p3 = scmp.eq.s32.totalorder %s308_s16, 1 }
   0xa   : > { %p597_p4 = por %p587_p1, %p53_p0  ;;  %p309_p5 = scmp.ge.s32.totalorder %s533_s14, 1 }
   0xb   : > { %p602_p6 = por %p111_p3, %p53_p0  ;;  %p118_p7 = scmp.lt.s32.totalorder %s533_s14, 3 }
   0xc   : > { %s720_s19 = scalar_select %p597_p4, 1, 0 }
   0xd   : > { %s721_s20 = scalar_select %p602_p6, 1, 0 }
   0xe   : > { %p607_p8 = pnand %p309_p5, %p118_p7  ;;  %s535_s22 = smov [#allocation5]  }
   0xf   : > { %s133_s23 = sshll.u32 %s535_s22, 4  ;;  %s28_s25 = sadd.s32 1, %s529_s13  ;;  %s134_s23 = int_to_ptr.vmem [resolvable:$true] %s133_s23 }
  0x10   : > { %p330_p10 = pneg %p607_p8  ;;  %s40_s26 = sadd.s32 1, %s521_s11 }
  0x11   : > { %p29_p12 = scmp.ge.s32.totalorder %s28_s25, 2  ;;  %s406_s27 = scalar_lea.vmem %s134_s23, 32 }
  0x12   : > { %p616_p11 = pnand %p330_p10, %p587_p1  ;;  %p407_p0 = scmp.ne.s32.totalorder %s134_s23, %s406_s27 }
  0x13   : > { %p414_p7 = scmp.lt.s32.totalorder %s134_s23, %s134_s23  ;;  %p415_p6 = scmp.lt.s32.totalorder %s406_s27, %s406_s27 }
  0x14   : > { %p397_p13 = pneg %p616_p11 }
  0x15   : > { %p416_p9 = por %p415_p6, %p414_p7 }
  0x16   : > { %p409_p3 = pnand %p407_p0, %p397_p13 }
  0x18   : > { %p410_p5 = pneg %p409_p3 }
  0x1a   : > { %p417_p4 = pnand %p416_p9, %p410_p5 }
  0x1c   : > { %420 = shalt.err (!%p417_p4)
}
  0x1d   : > { %333 = dma.hbm_to_vmem [thread:$0]  (!%p616_p11), %s715_s1, 32, %s134_s23, [#allocation6]  }
  0x1e   : > { %s735_s25 = smov (%p29_p12, %s28_s25), 0  ;;  %p47_p6 = scmp.ne.s32.totalorder %s521_s11, %s517_s10 }
  0x1f   : > { %p48_p4 = scmp.eq.s32.totalorder %s533_s14, 0  ;;  %s35_s30 = ssub.s32 %s529_s13, %s735_s25 }
  0x20   : > { %p343_p9 = scmp.lt.s32.totalorder %s533_s14, 2  ;;  %p38_p10 = scmp.eq.s32.totalorder %s35_s30, 0 }
  0x21   : > { %p49_p13 = por %p48_p4, %p47_p6  ;;  %p639_p0 = por %p591_p2, %p47_p6 }
  0x22   : > { %s144_s4 = sand.u32 1, %s521_s11   ;;  %s313_s7 = sshll.u32 %s529_s13, 5 }
  0x23   : > { %s645_s5 = scalar_select %p38_p10, %s521_s11, %s40_s26  }
  0x24   : > { %s312_s6 = sshll.u32 %s144_s4, 1  ;;  %s154_s16 = scalar_lea.hbm %s714_s0, %s313_s7 }
  0x25   : > { %s148_s22 = scalar_lea.vmem [#allocation2], %s312_s6  ;;  %p651_p11 = pnand %p343_p9, %p49_p13 }
  0x26   : > { %s156_s23 = sshll.u32 %s148_s22, 4  ;;  %s145_s18 = scalar_lea.sflag [#allocation3], %s144_s4  ;;  %s157_s23 = int_to_ptr.vmem [resolvable:$true] %s156_s23 }
  0x27   : > { %p423_p2 = pneg %p651_p11  ;;  %s434_s27 = scalar_lea.vmem %s157_s23, 32 }
  0x28   : > { %p435_p12 = scmp.ne.s32.totalorder %s157_s23, %s434_s27  ;;  %s536_s26 = smov [#allocation2]  }
  0x29   : > { %s439_s28 = sshll.u32 %s536_s26, 4  ;;  %s440_s28 = int_to_ptr.vmem [resolvable:$false] %s439_s28 }
  0x2a   : > { %p437_p3 = pnand %p435_p12, %p423_p2  ;;  %s441_s29 = scalar_lea.vmem %s440_s28, 64 }
  0x2b   : > { %p442_p7 = scmp.lt.s32.totalorder %s157_s23, %s440_s28  ;;  %p443_p6 = scmp.lt.s32.totalorder %s441_s29, %s434_s27 }
  0x2c   : > { %p438_p5 = pneg %p437_p3 }
  0x2d   : > { %p444_p4 = por %p443_p6, %p442_p7 }
  0x2f   : > { %p445_p10 = pnand %p444_p4, %p438_p5 }
  0x31   : > { %448 = shalt.err (!%p445_p10)
}
  0x32   : > { %337 = dma.hbm_to_vmem [thread:$0]  (!%p651_p11), %s154_s16, 32, %s157_s23, %s145_s18  }
  0x33   : > { %165 = sbr.rel (%p607_p8) target bundleno = 83 (0x53), region = 28  ;;  %s662_s30 = sand.u32 (!%p607_p8), 1, %s517_s10  }
  0x34   : > { %s315_s4 = sshll.u32 (!%p607_p8), %s662_s30, 1  ;;  %s168_s6 = scalar_lea.sflag (!%p607_p8), [#allocation3], %s662_s30 }
  0x35   : > { %s171_s7 = scalar_lea.vmem (!%p607_p8), [#allocation2], %s315_s4  ;;  %p726_p9 = scmp.ne.s32.totalorder (!%p607_p8), %s720_s19, 0 }
  0x38   : > { %500 = dma.done.wait (%p726_p9), %s168_s6, 32  }
  0x39   : > { %502 = vsyncadd (%p726_p9), %s168_s6, 4294967264 }
  0x3a   : > { %504 = dma.done.wait (%p587_p1), [#allocation6], 32  }
  0x3b   : > { %506 = vsyncadd (%p587_p1), [#allocation6], 4294967264  ;;  %s195_s21 = scalar_lea.vmem [#allocation7], %s315_s4  ;;  %s319_s15 = sshll.u32 %s525_s12, 5  ;;  %v196_v0 = vld [vmem:[%s171_s7] sm:$0x3] }
  0x3c   : > { %s215_s8 = sshll.u32 %s195_s21, 4  ;;  %v197_v1 = vld [vmem:[#allocation5] sm:$0x3]  ;;  %s213_s19 = scalar_lea.hbm %s716_s2, %s319_s15  ;;  %s216_s8 = int_to_ptr.vmem [resolvable:$true] %s215_s8 }
  0x3d   : > { %v198_v2 = vadd.f32 %v197_v1, %v196_v0  ;;  %s201_s23 = scalar_lea.sflag [#allocation4], %s662_s30  ;;  %s449_s24 = scalar_lea.vmem %s216_s8, 32 }
  0x3e   : > { %p450_p8 = scmp.ne.s32.totalorder %s216_s8, %s449_s24  ;;  %s537_s17 = smov [#allocation7]  }
  0x3f   : > { %199 = vst [vmem:[%s195_s21] sm:$0x3] %v198_v2  ;;  %s453_s18 = sshll.u32 %s537_s17, 4  ;;  %s454_s18 = int_to_ptr.vmem [resolvable:$false] %s453_s18 }
  0x40   : > { %p451_p1 = pnand %p450_p8, %p639_p0  ;;  %s455_s27 = scalar_lea.vmem %s454_s18, 64 }
  0x41   : > { %p456_p11 = scmp.lt.s32.totalorder %s216_s8, %s454_s18  ;;  %p457_p2 = scmp.lt.s32.totalorder %s455_s27, %s449_s24 }
  0x42   : > { %p452_p13 = pneg %p451_p1 }
  0x43   : > { %p458_p12 = por %p457_p2, %p456_p11 }
  0x45   : > { %p459_p3 = pnand %p458_p12, %p452_p13 }
  0x47   : > { %462 = shalt.err (!%p459_p3)
}
  0x48   : > { %s463_s12 = scalar_lea.hbm %s213_s19, 32  ;;  %s467_s29 = scalar_lea.hbm %s716_s2, 64 }
  0x49   : > { %p464_p5 = scmp.ne.s32.totalorder %s213_s19, %s463_s12  ;;  %p468_p4 = scmp.lt.s32.totalorder %s213_s19, %s716_s2 }
  0x4a   : > { %p469_p10 = scmp.lt.s32.totalorder %s467_s29, %s463_s12 }
  0x4b   : > { %p465_p7 = pnand %p464_p5, %p639_p0 }
  0x4c   : > { %p470_p9 = por %p469_p10, %p468_p4 }
  0x4d   : > { %p466_p6 = pneg %p465_p7 }
  0x4f   : > { %p471_p8 = pnand %p470_p9, %p466_p6 }
  0x51   : > { %474 = shalt.err (!%p471_p8)
}
  0x52   : > { %328 = dma.vmem_to_hbm [thread:$0]  (%p639_p0), %s216_s8, 32, %s213_s19, %s201_s23  }
  0x53 PF: > { %s227_s6 = sand.u32 1, %s513_s9   ;;  %p727_p1 = scmp.ne.s32.totalorder %s721_s20, 0 }
  0x54   : > { %p728_p13 = scmp.ge.s32.totalorder %s533_s14, 2  ;;  %s228_s7 = scalar_lea.sflag [#allocation4], %s227_s6 }
  0x56   : > { %p339_p11 = pnand %p728_p13, %p727_p1 }
  0x58   : > { %p340_p2 = pneg %p339_p11 }
  0x5a   : > { %508 = dma.done.wait (%p340_p2), %s228_s7, 32  }
  0x5b   : > { %510 = vsyncadd (%p340_p2), %s228_s7, 4294967264  ;;  %s19_s14 = sadd.s32 1, %s533_s14   ;;  %s729_s9 = smov %s517_s10 }
  0x5c   : > { %p16_p12 = scmp.ge.s32.totalorder %s19_s14, 4   ;;  %s730_s10 = smov %s521_s11 }
  0x5d   : > { %s731_s11 = smov %s645_s5  ;;  %s732_s12 = smov %s529_s13 }
  0x5e   : > { %s733_s13 = smov %s735_s25  ;;  %18 = sbr.rel (!%p16_p12) target bundleno = 7 (0x7), region = 78 }
  0x63   :  { %233 = vsyncpa [#allocation3], 1 }
  0x64   :  { %235 = vsyncpa [#allocation3 + $0x1], 1 }
  0x65   :  { %236 = vsyncpa [#allocation6], 1 }
  0x66   :  { %237 = vsyncpa [#allocation4], 1 }
  0x67   :  { %239 = vsyncpa [#allocation4 + $0x1], 1 }

</bundles_post_ra>
